<compile_context>
chip_gen: v7x
topology: tpu7x:2x2x1
jax: 0.10.0
libtpu: 0.0.40
codegen_flags: <defaults>
</compile_context>

<pallas_src>
import functools

import jax
import jax.numpy as jnp
from jax.experimental import pallas as pl
from jax.experimental.pallas import tpu as pltpu

_LANES = 128
_MIB = 1 << 20

# Per-block byte budget.  3 live arrays (x, y, out) x 2 pipeline buffers =
# 6 blocks resident in VMEM.  Conservative default: 4 MiB blocks -> 24 MiB
# total, safe on every generation once the scoped limit is raised explicitly.
# When the chip is queryable we grow to 8 MiB blocks (48 MiB total), which
# fits v7x's 64 MiB physical VMEM and v5e/v6e's 128 MiB with headroom.
_DEFAULT_BLOCK_BYTES = 4 * _MIB
_MAX_BLOCK_BYTES = 8 * _MIB
_VMEM_HEADROOM = 8 * _MIB
_LIVE_BLOCKS = 6  # 3 arrays x 2 pipeline buffers


def _gm_loss_kernel(x_ref, y_ref, o_ref):
    # Pure VPU elementwise; exact division keeps 1e-6 parity with the PyTorch
    # reference (compute is fully hidden under the HBM DMA on every chip).
    d = x_ref[...] - y_ref[...]
    d2 = d * d
    o_ref[...] = 2.0 * d2 / (d2 + 4.0)


@functools.lru_cache(maxsize=None)
def _block_byte_budget():
    """Per-block byte budget, derived from physical VMEM when queryable."""
    try:
        cap = int(pltpu.get_tpu_info().vmem_capacity_bytes)
    except Exception:  # query unsupported -> conservative default
        cap = 0
    if cap < 32 * _MIB:
        return _DEFAULT_BLOCK_BYTES
    return int(min(_MAX_BLOCK_BYTES,
                   max(_MIB, (cap - _VMEM_HEADROOM) // _LIVE_BLOCKS)))


def _round_up(x, m):
    return ((x + m - 1) // m) * m


def _pick_tile(extent, max_extent, unit):
    """Tile size along the blocked axis: as big as the byte budget allows,
    a multiple of `unit`, and split into an even number of roughly equal
    blocks so a dual-TensorCore chip (v7x) sees balanced work."""
    max_extent = max(unit, (max_extent // unit) * unit)
    if extent <= max_extent:
        if extent < 2 * unit:
            return extent  # single block spanning the array (exempt from (8,128))
        n_blocks = 2
    else:
        n_blocks = pl.cdiv(extent, max_extent)
        if n_blocks % 2:
            n_blocks += 1  # even count -> both TCs get the same number of blocks
    return _round_up(pl.cdiv(extent, n_blocks), unit)


def geman_mcclure_loss(x, y, *, block_bytes=None):
    assert x.shape == y.shape, "x and y must have the same shape"
    assert x.dtype == y.dtype, "x and y must have the same dtype"
    assert jnp.issubdtype(x.dtype, jnp.floating), (
        "GemanMcClureLoss expects floating-point inputs")

    orig_shape = x.shape
    dtype = x.dtype
    n = x.size
    if n == 0:
        return jnp.zeros(orig_shape, dtype)

    if block_bytes is None:
        block_bytes = _block_byte_budget()
    itemsize = jnp.dtype(dtype).itemsize
    # Sub-32-bit dtypes pack along sublanes: f32 -> 8, bf16 -> 16, int8 -> 32.
    sub = 8 * max(1, 4 // itemsize)

    if n % _LANES == 0:
        # Fast path (typical NCHW sizes): contiguous reshape to a lane-dense
        # (rows, 128) slab — no HBM copy around the kernel, every load/store
        # is a full unmasked vreg op.
        rows = n // _LANES
        tr = _pick_tile(rows, block_bytes // (itemsize * _LANES), sub)
        grid = (pl.cdiv(rows, tr),)
        spec = pl.BlockSpec((tr, _LANES), lambda i: (i, 0))
        args = (x.reshape(rows, _LANES), y.reshape(rows, _LANES))
        out_shape = jax.ShapeDtypeStruct((rows, _LANES), dtype)
    else:
        # Ragged path: flat 1-D blocks sized in whole fully-packed vregs
        # (sub * 128 elements).  The trailing partial block is handled by
        # Pallas boundary masking (inputs padded, output stores masked), so
        # there are no wrapper-side pad / slice HBM copies.
        chunk = sub * _LANES
        te = _pick_tile(n, block_bytes // itemsize, chunk)
        grid = (pl.cdiv(n, te),)
        spec = pl.BlockSpec((te,), lambda i: (i,))
        args = (x.reshape(-1), y.reshape(-1))
        out_shape = jax.ShapeDtypeStruct((n,), dtype)

    out = pl.pallas_call(
        _gm_loss_kernel,
        out_shape=out_shape,
        grid_spec=pltpu.PrefetchScalarGridSpec(
            num_scalar_prefetch=0,
            grid=grid,
            in_specs=[spec, spec],
            out_specs=spec,
        ),
        compiler_params=pltpu.CompilerParams(
            # "parallel" lets the streaming grid be sharded across TensorCores
            # on multi-core parts; measured-neutral on single-TC chips.
            dimension_semantics=("parallel",),
            # Raise the scoped-VMEM limit so the big double-buffered blocks
            # fit (24–48 MiB + headroom); stays below every generation's
            # physical VMEM (64 MiB v7x, 128 MiB v5e/v6e).
            vmem_limit_bytes=_LIVE_BLOCKS * block_bytes + _VMEM_HEADROOM,
        ),
    )(*args)

    return out.reshape(orig_shape)


if __name__ == "__main__":
    key = jax.random.PRNGKey(0)

    def ref_fn(a, b):
        d = a - b
        return 2.0 * d**2 / (d**2 + 4.0)

    k0, k1, k2, k3, k4, k5 = jax.random.split(key, 6)

    # 1) Typical NCHW-shaped input: fast lane-dense 2-D path, multi-block grid.
    x = jax.random.normal(k0, (2, 4, 16, 16), dtype=jnp.float32)
    y = jax.random.normal(k1, (2, 4, 16, 16), dtype=jnp.float32)
    out = jax.block_until_ready(geman_mcclure_loss(x, y))
    assert out.shape == x.shape and out.dtype == x.dtype
    assert jnp.allclose(out, ref_fn(x, y), atol=1e-6, rtol=1e-6)

    # 2) Ragged size, single full-array 1-D block.
    xr = jax.random.normal(k2, (3, 5, 7), dtype=jnp.float32)
    yr = jax.random.normal(k3, (3, 5, 7), dtype=jnp.float32)
    outr = jax.block_until_ready(geman_mcclure_loss(xr, yr))
    assert outr.shape == xr.shape and outr.dtype == xr.dtype
    assert jnp.allclose(outr, ref_fn(xr, yr), atol=1e-6, rtol=1e-6)

    # 3) Ragged size, multi-block 1-D grid with a masked partial tail block.
    xt = jax.random.normal(k4, (3000,), dtype=jnp.float32)
    yt = jax.random.normal(k5, (3000,), dtype=jnp.float32)
    outt = jax.block_until_ready(geman_mcclure_loss(xt, yt))
    assert outt.shape == xt.shape and outt.dtype == xt.dtype
    assert jnp.allclose(outt, ref_fn(xt, yt), atol=1e-6, rtol=1e-6)

    print("KERNEL_OK")
</pallas_src>

<mosaic_0001>
module attributes {stable_mosaic.version = 11 : i64} {
  func.func @_gm_loss_kernel(%arg0: i32, %arg1: memref<8x128xf32, #tpu.memory_space<vmem>>, %arg2: memref<8x128xf32, #tpu.memory_space<vmem>>, %arg3: memref<8x128xf32, #tpu.memory_space<vmem>>) attributes {dimension_semantics = [#tpu.dimension_semantics<parallel>], iteration_bounds = array<i64: 2>, scalar_prefetch = 0 : i64, scratch_operands = 0 : i64, tpu.core_type = #tpu.core_type<tc>, window_params = [{transform_indices = @transform_0, window_bounds = array<i64: 8, 128>}, {transform_indices = @transform_1, window_bounds = array<i64: 8, 128>}, {transform_indices = @transform_2, window_bounds = array<i64: 8, 128>}]} {
    %c0 = arith.constant 0 : index
    %c0_0 = arith.constant 0 : index
    %0 = vector.load %arg1[%c0, %c0_0] : memref<8x128xf32, #tpu.memory_space<vmem>>, vector<8x128xf32>
    %c0_1 = arith.constant 0 : index
    %c0_2 = arith.constant 0 : index
    %1 = vector.load %arg2[%c0_1, %c0_2] : memref<8x128xf32, #tpu.memory_space<vmem>>, vector<8x128xf32>
    %2 = arith.subf %0, %1 : vector<8x128xf32>
    %3 = arith.mulf %2, %2 : vector<8x128xf32>
    %cst = arith.constant 2.000000e+00 : f32
    %4 = vector.broadcast %cst : f32 to vector<8x128xf32>
    %5 = arith.mulf %4, %3 : vector<8x128xf32>
    %cst_3 = arith.constant 4.000000e+00 : f32
    %6 = vector.broadcast %cst_3 : f32 to vector<8x128xf32>
    %7 = arith.addf %3, %6 : vector<8x128xf32>
    %8 = arith.divf %5, %7 : vector<8x128xf32>
    %c0_4 = arith.constant 0 : index
    %c0_5 = arith.constant 0 : index
    %9 = vector.load %arg3[%c0_4, %c0_5] : memref<8x128xf32, #tpu.memory_space<vmem>>, vector<8x128xf32>
    tpu.vector_store %arg3[%c0_4, %c0_5], %8 {strides = array<i32>} : memref<8x128xf32, #tpu.memory_space<vmem>>, vector<8x128xf32>,
    return
  }
  func.func @transform_0(%arg0: i32) -> (i32, i32) {
    %c0_i32 = arith.constant 0 : i32
    %c0_i32_0 = arith.constant 0 : i32
    return %arg0, %c0_i32 : i32, i32
  }
  func.func @transform_1(%arg0: i32) -> (i32, i32) {
    %c0_i32 = arith.constant 0 : i32
    %c0_i32_0 = arith.constant 0 : i32
    return %arg0, %c0_i32 : i32, i32
  }
  func.func @transform_2(%arg0: i32) -> (i32, i32) {
    %c0_i32 = arith.constant 0 : i32
    %c0_i32_0 = arith.constant 0 : i32
    return %arg0, %c0_i32 : i32, i32
  }
}

</mosaic_0001>

<bundles_post_ra>
// kernel: tpu_custom_call.1
= control target key start
LH: loop header
LB: loop body
LE: loop exit
PB: predicated region body
PF: predicated region fallthrough
CT: control target
= control target key end

     0   :  { %7 = vsyncpa [#allocation3], 0  ;;  %s739_s0 = inlined_call_operand.hbm [shape: f32[16,128], index: 0, kind: input, shape index: {}]   ;;  %s740_s1 = inlined_call_operand.hbm [shape: f32[16,128], index: 1, kind: input, shape index: {}]   ;;  %s741_s2 = inlined_call_operand.hbm [shape: f32[16,128], index: 2, kind: output, shape index: {}]  }
   0x1   :  { %9 = vsyncpa [#allocation3 + $0x1], 0 }
   0x2   :  { %10 = vsyncpa [#allocation6], 0 }
   0x3   :  { %12 = vsyncpa [#allocation6 + $0x1], 0 }
   0x4   :  { %13 = vsyncpa [#allocation4], 0 }
   0x5   :  { %15 = vsyncpa [#allocation4 + $0x1], 0  ;;  %s530_s9 = smov 0   ;;  %s532_s10 = smov 0  }
   0x6   :  { %s534_s11 = smov 0   ;;  %s536_s12 = smov 0  }
   0x7 LB: > { %s551_s13 = sadd.s32 4294967295, %s510_s12   ;;  %s312_s14 = sadd.s32 4294967294, %s510_s12   ;;  %s510_s12 = sphi %s536_s12, %s760_s12   ;;  %s506_s11 = sphi %s534_s11, %s759_s11   ;;  %s502_s10 = sphi %s532_s10, %s758_s10   ;;  %s498_s9 = sphi %s530_s9, %s757_s9  }
   0x8   : > { %s555_s15 = sadd.s32 1, %s510_s12   ;;  %s28_s16 = sadd.s32 1, %s506_s11 }
   0x9   : > { %s25_s17 = ssub.s32 %s510_s12, %s555_s15  ;;  %p35_p0 = scmp.ne.s32.totalorder %s506_s11, %s502_s10 }
   0xa   : > { %p26_p1 = scmp.eq.s32.totalorder %s25_s17, 0  ;;  %p36_p2 = scmp.eq.s32.totalorder %s510_s12, 0 }
   0xb   : > { %p41_p3 = scmp.ne.s32.totalorder %s502_s10, %s498_s9  ;;  %p42_p4 = scmp.eq.s32.totalorder %s551_s13, 0 }
   0xc   : > { %s567_s18 = scalar_select %p26_p1, %s506_s11, %s28_s16  }
   0xd   : > { %p569_p5 = por %p36_p2, %p35_p0  ;;  %p573_p6 = por %p42_p4, %p41_p3 }
   0xe   : > { %p91_p7 = scmp.eq.s32.totalorder %s551_s13, 1  ;;  %p97_p8 = scmp.eq.s32.totalorder %s312_s14, 1 }
   0xf   : > { %s745_s20 = scalar_select %p573_p6, 1, 0 }
  0x10   : > { %p344_p10 = scmp.lt.s32.totalorder %s510_s12, 2  ;;  %p580_p11 = por %p91_p7, %p35_p0 }
  0x11   : > { %p584_p12 = por %p97_p8, %p41_p3  ;;  %s589_s23 = sand.u32 1, %s506_s11  }
  0x12   : > { %s746_s21 = scalar_select %p580_p11, 1, 0 }
  0x13   : > { %s747_s22 = scalar_select %p584_p12, 1, 0 }
  0x14   : > { %s316_s24 = sshll.u32 %s510_s12, 7  ;;  %s315_s25 = sshll.u32 %s589_s23, 3 }
  0x15   : > { %s598_s28 = scalar_lea.hbm %s739_s0, %s316_s24  ;;  %s121_s29 = scalar_lea.vmem [#allocation2], %s315_s25 }
  0x16   : > { %s128_s30 = sshll.u32 %s121_s29, 4  ;;  %p604_p13 = pnand %p344_p10, %p569_p5  ;;  %s608_s30 = int_to_ptr.vmem [resolvable:$true] %s128_s30 }
  0x17   : > { %s118_s4 = scalar_lea.sflag [#allocation3], %s589_s23  ;;  %s380_s5 = scalar_lea.hbm %s598_s28, 128 }
  0x18   : > { %p381_p2 = scmp.ne.s32.totalorder %s598_s28, %s380_s5  ;;  %p382_p3 = pneg %p604_p13 }
  0x19   : > { %s385_s8 = scalar_lea.hbm %s739_s0, 256  ;;  %p386_p5 = scmp.lt.u32.totalorder %s598_s28, %s739_s0 }
  0x1a   : > { %p383_p4 = pnand %p382_p3, %p381_p2  ;;  %p387_p8 = scmp.lt.u32.totalorder %s385_s8, %s380_s5 }
  0x1b   : > { %p389_p9 = scmp.lt.u32.totalorder %s380_s5, %s598_s28 }
  0x1c   : > { %p384_p7 = pneg %p383_p4  ;;  %p388_p10 = por %p387_p8, %p386_p5 }
  0x1e   : > { %p390_p0 = por %p389_p9, %p388_p10 }
  0x20   : > { %p391_p1 = pnand %p390_p0, %p384_p7 }
  0x22   : > { %394 = shalt.err (!%p391_p1)
}
  0x23   : > { %s395_s17 = scalar_lea.vmem %s608_s30, 128  ;;  %s512_s19 = smov [#allocation2]  }
  0x24   : > { %p396_p2 = scmp.ne.s32.totalorder %s608_s30, %s395_s17  ;;  %s400_s26 = sshll.u32 %s512_s19, 4  ;;  %s401_s26 = int_to_ptr.vmem [resolvable:$false] %s400_s26 }
  0x25   : > { %s402_s27 = scalar_lea.vmem %s401_s26, 256  ;;  %p403_p11 = scmp.lt.s32.totalorder %s608_s30, %s401_s26 }
  0x26   : > { %p398_p4 = pnand %p396_p2, %p382_p3  ;;  %p404_p5 = scmp.lt.s32.totalorder %s402_s27, %s395_s17 }
  0x28   : > { %p399_p12 = pneg %p398_p4  ;;  %p405_p8 = por %p404_p5, %p403_p11 }
  0x2a   : > { %p406_p9 = pnand %p405_p8, %p399_p12 }
  0x2c   : > { %409 = shalt.err (!%p406_p9)
}
  0x2d   : > { %336 = dma.hbm_to_vmem [thread:$0]  (!%p604_p13), %s598_s28, 128, %s608_s30, %s118_s4  }
  0x2e   : > { %p749_p0 = scmp.lt.s32.totalorder %s510_s12, 3  ;;  %p750_p1 = scmp.ge.s32.totalorder %s510_s12, 1 }
  0x2f   : > { %s651_s7 = scalar_lea.hbm %s740_s1, %s316_s24  ;;  %s139_s8 = scalar_lea.vmem [#allocation5], %s315_s25 }
  0x30   : > { %p642_p7 = pnand %p750_p1, %p749_p0  ;;  %s146_s14 = sshll.u32 %s139_s8, 4  ;;  %s147_s14 = int_to_ptr.vmem [resolvable:$true] %s146_s14 }
  0x31   : > { %s136_s28 = scalar_lea.sflag [#allocation6], %s589_s23  ;;  %s410_s30 = scalar_lea.hbm %s651_s7, 128 }
  0x32   : > { %s751_s29 = scalar_select %p642_p7, 1, 0 }
  0x33   : > { %p411_p11 = scmp.ne.s32.totalorder %s651_s7, %s410_s30  ;;  %s415_s24 = scalar_lea.hbm %s740_s1, 256 }
  0x34   : > { %p416_p2 = scmp.lt.u32.totalorder %s651_s7, %s740_s1  ;;  %p417_p4 = scmp.lt.u32.totalorder %s415_s24, %s410_s30 }
  0x35   : > { %p413_p12 = pnand %p411_p11, %p382_p3  ;;  %p419_p8 = scmp.lt.u32.totalorder %s410_s30, %s651_s7 }
  0x36   : > { %p418_p5 = por %p417_p4, %p416_p2 }
  0x37   : > { %p414_p10 = pneg %p413_p12 }
  0x38   : > { %p420_p9 = por %p419_p8, %p418_p5 }
  0x3a   : > { %p421_p0 = pnand %p420_p9, %p414_p10 }
  0x3c   : > { %424 = shalt.err (!%p421_p0)
}
  0x3d   : > { %s425_s23 = scalar_lea.vmem %s147_s14, 128  ;;  %s513_s25 = smov [#allocation5]  }
  0x3e   : > { %p426_p1 = scmp.ne.s32.totalorder %s147_s14, %s425_s23  ;;  %s430_s26 = sshll.u32 %s513_s25, 4  ;;  %s431_s26 = int_to_ptr.vmem [resolvable:$false] %s430_s26 }
  0x3f   : > { %s432_s27 = scalar_lea.vmem %s431_s26, 256  ;;  %p433_p6 = scmp.lt.s32.totalorder %s147_s14, %s431_s26 }
  0x40   : > { %p428_p11 = pnand %p426_p1, %p382_p3  ;;  %p434_p7 = scmp.lt.s32.totalorder %s432_s27, %s425_s23 }
  0x42   : > { %p429_p12 = pneg %p428_p11  ;;  %p435_p2 = por %p434_p7, %p433_p6 }
  0x44   : > { %p436_p4 = pnand %p435_p2, %p429_p12 }
  0x46   : > { %439 = shalt.err (!%p436_p4)
}
  0x47   : > { %339 = dma.hbm_to_vmem [thread:$0]  (!%p604_p13), %s651_s7, 128, %s147_s14, %s136_s28  }
  0x48   : > { %p752_p10 = scmp.ne.s32.totalorder %s751_s29, 0 }
  0x49   : > { %s678_s5 = sand.u32 (!%p752_p10), 1, %s502_s10   ;;  %p753_p3 = scmp.ne.s32.totalorder (!%p752_p10), %s745_s20, 0 }
  0x4a   : > { %155 = sbr.rel (%p752_p10) target bundleno = 118 (0x76), region = 28  ;;  %s320_s6 = sshll.u32 (!%p752_p10), %s678_s5, 3 }
  0x4b   : > { %s158_s8 = scalar_lea.sflag (!%p752_p10), [#allocation3], %s678_s5  ;;  %s161_s30 = scalar_lea.vmem (!%p752_p10), [#allocation2], %s320_s6 }
  0x51   : > { %485 = dma.done.wait (%p753_p3), %s158_s8, 128  }
  0x52   : > { %487 = vsyncadd (%p753_p3), %s158_s8, 4294967168  ;;  %s167_s3 = scalar_lea.sflag [#allocation6], %s678_s5  ;;  %s170_s7 = scalar_lea.vmem [#allocation5], %s320_s6 }
  0x53   : > { %489 = dma.done.wait (%p753_p3), %s167_s3, 128  }
  0x54   : > { %491 = vsyncadd (%p753_p3), %s167_s3, 4294967168  ;;  %v196_v0 = vld [vmem:[%s161_s30] sm:$0xff]  ;;  %v197_v1 = vld [vmem:[%s170_s7] sm:$0xff]  ;;  %s195_s29 = scalar_lea.vmem [#allocation7], %s320_s6  ;;  %s324_s28 = sshll.u32 %s551_s13, 7 }
  0x55   : > { %v198_v2 = vsub.f32 %v196_v0, %v197_v1  ;;  %s219_s14 = sshll.u32 %s195_s29, 4  ;;  %s697_s16 = scalar_lea.hbm %s741_s2, %s324_s28  ;;  %s692_s14 = int_to_ptr.vmem [resolvable:$true] %s219_s14 }
  0x56   : > { %s206_s24 = scalar_lea.sflag [#allocation4], %s678_s5  ;;  %s440_s17 = scalar_lea.vmem %s692_s14, 128 }
  0x57   : > { %v199_v3 = vmul.f32 %v198_v2, %v198_v2  ;;  %p441_p6 = scmp.ne.s32.totalorder %s692_s14, %s440_s17  ;;  %p754_p13 = scmp.ne.s32.totalorder %s746_s21, 0 }
  0x58   : > { %s514_s13 = smov [#allocation7]  }
  0x59   : > { %v201_v4 = vadd.f32 4.0, %v199_v3  ;;  %v200_v5 = vmul.f32 2.0, %v199_v3  ;;  %p442_p7 = pnand %p441_p6, %p754_p13  ;;  %s444_s19 = sshll.u32 %s514_s13, 4  ;;  %s445_s19 = int_to_ptr.vmem [resolvable:$false] %s444_s19 }
  0x5a   : > { %s446_s23 = scalar_lea.vmem %s445_s19, 256  ;;  %p447_p8 = scmp.lt.s32.totalorder %s692_s14, %s445_s19 }
  0x5b   : > { %378 = vrcp.f32 %v201_v4  ;;  %p443_p5 = pneg %p442_p7  ;;  %p448_p9 = scmp.lt.s32.totalorder %s446_s23, %s440_s17 }
  0x5d   : > { %p449_p0 = por %p448_p9, %p447_p8 }
  0x5f   : > { %p450_p1 = pnand %p449_p0, %p443_p5 }
  0x65   : > { %v379_v6 = vpop.eup %378 }
  0x66   : > { %v203_v7 = vmul.f32 %v379_v6, %v200_v5 }
  0x68   : > { %204 = vst [vmem:[%s195_s29] sm:$0xff] %v203_v7 }
  0x69   : > { %453 = shalt.err (!%p450_p1)
}
  0x6a   : > { %s454_s25 = scalar_lea.hbm %s697_s16, 128  ;;  %s458_s5 = scalar_lea.hbm %s741_s2, 256 }
  0x6b   : > { %p455_p11 = scmp.ne.s32.totalorder %s697_s16, %s454_s25  ;;  %p459_p4 = scmp.lt.u32.totalorder %s697_s16, %s741_s2 }
  0x6c   : > { %p460_p10 = scmp.lt.u32.totalorder %s458_s5, %s454_s25  ;;  %p462_p6 = scmp.lt.u32.totalorder %s454_s25, %s697_s16 }
  0x6d   : > { %p456_p12 = pnand %p455_p11, %p754_p13 }
  0x6e   : > { %p461_p3 = por %p460_p10, %p459_p4 }
  0x6f   : > { %p457_p2 = pneg %p456_p12 }
  0x70   : > { %p463_p7 = por %p462_p6, %p461_p3 }
  0x72   : > { %p464_p5 = pnand %p463_p7, %p457_p2 }
  0x74   : > { %467 = shalt.err (!%p464_p5)
}
  0x75   : > { %331 = dma.vmem_to_hbm [thread:$0]  (%p754_p13), %s692_s14, 128, %s697_s16, %s206_s24  }
  0x76 PF: > { %s231_s30 = sand.u32 1, %s498_s9   ;;  %p755_p8 = scmp.ne.s32.totalorder %s747_s22, 0 }
  0x77   : > { %p756_p9 = scmp.ge.s32.totalorder %s510_s12, 2  ;;  %s232_s3 = scalar_lea.sflag [#allocation4], %s231_s30 }
  0x79   : > { %p341_p0 = pnand %p756_p9, %p755_p8 }
  0x7b   : > { %493 = dma.done.wait (!%p341_p0), %s232_s3, 128  }
  0x7c   : > { %495 = vsyncadd (!%p341_p0), %s232_s3, 4294967168  ;;  %p18_p1 = scmp.ge.s32.totalorder %s555_s15, 4   ;;  %s757_s9 = smov %s502_s10 }
  0x7d   : > { %s758_s10 = smov %s506_s11  ;;  %s759_s11 = smov %s567_s18 }
  0x7e   : > { %s760_s12 = smov %s555_s15  ;;  %20 = sbr.rel (!%p18_p1) target bundleno = 7 (0x7), region = 86 }
  0x85   :  { %237 = vsyncpa [#allocation3], 1 }
  0x86   :  { %239 = vsyncpa [#allocation3 + $0x1], 1 }
  0x87   :  { %240 = vsyncpa [#allocation6], 1 }
  0x88   :  { %242 = vsyncpa [#allocation6 + $0x1], 1 }
  0x89   :  { %243 = vsyncpa [#allocation4], 1 }
  0x8a   :  { %245 = vsyncpa [#allocation4 + $0x1], 1 }

</bundles_post_ra>
